<compile_context>
chip_gen: v5e
topology: v5e:2x2
jax: 0.10.0
libtpu: 0.0.40
codegen_flags: <defaults>
</compile_context>

<pallas_src>
import jax
import jax.numpy as jnp
from jax.experimental import pallas as pl
from jax.experimental.pallas import tpu as pltpu


def _round_up(n, m):
    return ((n + m - 1) // m) * m


def _cdiv(a, b):
    return (a + b - 1) // b


def _silu(v):
    # exp -> EUP; divide -> EUP vrcp (approx).  Keeps SiLU off the VALU slot.
    return v * pl.reciprocal(1.0 + jnp.exp(-v), approx=True)


# --------------------------------------------------------------------------
# Kernel
# --------------------------------------------------------------------------
def tdnn_kernel(x_ref, wf_ref, bf_ref,
                w1_ref, b1_ref,
                w2_ref, b2_ref,
                wo_ref, bo_ref, o_ref):
    # x tile streamed in bf16; bf16 MXU matmuls with f32 accumulation;
    # bias-add + SiLU in f32.
    x = x_ref[...]
    # fused (reshape Linear + 3 conv center-taps + BN) -> SiLU       (TB, 3H_p)
    c = _silu(jnp.dot(x, wf_ref[...], preferred_element_type=jnp.float32)
              + bf_ref[...])
    # fc1 (+BN folded) -> SiLU                                       (TB, H_p)
    f1 = _silu(jnp.dot(c.astype(jnp.bfloat16), w1_ref[...],
                       preferred_element_type=jnp.float32) + b1_ref[...])
    # fc2 (+BN folded) -> SiLU                                       (TB, H2_p)
    f2 = _silu(jnp.dot(f1.astype(jnp.bfloat16), w2_ref[...],
                       preferred_element_type=jnp.float32) + b2_ref[...])
    # Output layer: single real column -> VPU broadcast-mul + XLU lane-reduce
    # instead of a 99%-zero MXU matmul; narrow (TB, 1) store.
    o_ref[...] = (jnp.sum(f2 * wo_ref[...], axis=-1, keepdims=True)
                  + bo_ref[...])


# --------------------------------------------------------------------------
# Wrapper
# --------------------------------------------------------------------------
def tdnn_forward(x, p, *, tb=1024):
    B, F_in = x.shape

    # Batch tile: multiple of 128 (lane-friendly M for the MXU and safe for
    # bf16 sublane packing); when the batch is large enough force >= 2 grid
    # steps so both v7x TensorCores are used; otherwise a single tile.
    num_tiles = max(_cdiv(B, tb), 2 if B >= 256 else 1)
    TB = _round_up(_cdiv(B, num_tiles), 128)
    Bp = _round_up(B, TB)

    xp = x.astype(jnp.bfloat16)                      # halve streamed x bytes
    if Bp != B:
        xp = jnp.pad(xp, ((0, Bp - B), (0, 0)))

    C3P = p["wf"].shape[1]
    HP = p["w1"].shape[1]
    H2P = p["w2"].shape[1]

    grid = (Bp // TB,)

    def const_spec(arr):
        # Constant index_map -> weights stay VMEM-resident across the grid.
        return pl.BlockSpec(arr.shape, lambda i: (0, 0))

    in_specs = [
        pl.BlockSpec((TB, F_in), lambda i: (i, 0)),   # x tile (pipelined)
        const_spec(p["wf"]), const_spec(p["bf"]),     # weights: VMEM-resident
        const_spec(p["w1"]), const_spec(p["b1"]),
        const_spec(p["w2"]), const_spec(p["b2"]),
        const_spec(p["wo"]), const_spec(p["bo"]),
    ]
    # Narrow output block: last dim (1) equals the full array dim -> legal.
    out_specs = pl.BlockSpec((TB, 1), lambda i: (i, 0))

    def nbytes(a):
        return int(a.size) * a.dtype.itemsize

    weight_bytes = sum(nbytes(v) for v in p.values())
    x_tile_bytes = TB * F_in * xp.dtype.itemsize
    out_tile_bytes = TB * 4
    act_bytes = TB * (C3P + HP + H2P) * 6            # f32 temps + bf16 casts
    est = 2 * (weight_bytes + x_tile_bytes + out_tile_bytes) + act_bytes
    vmem_limit = int(min(64 * 1024 * 1024, max(16 * 1024 * 1024, 2 * est)))

    cost = pl.CostEstimate(
        flops=int(2 * Bp * (F_in * C3P + C3P * HP + HP * H2P + H2P)),
        transcendentals=int(Bp * (C3P + HP + H2P)),
        bytes_accessed=int(weight_bytes + nbytes(xp) + Bp * 4),
    )

    out = pl.pallas_call(
        tdnn_kernel,
        out_shape=jax.ShapeDtypeStruct((Bp, 1), jnp.float32),
        grid=grid,
        in_specs=in_specs,
        out_specs=out_specs,
        compiler_params=pltpu.CompilerParams(
            dimension_semantics=("parallel",),
            vmem_limit_bytes=vmem_limit,
        ),
        cost_estimate=cost,
    )(xp, p["wf"], p["bf"], p["w1"], p["b1"], p["w2"], p["b2"],
      p["wo"], p["bo"])

    return out[:B]


# --------------------------------------------------------------------------
# Parameter construction (torch-layout raw params), folding, and padding
# --------------------------------------------------------------------------
def init_raw_params(key, input_size, hidden_size, kernel_sizes=(3, 5, 7)):
    """Raw parameters in PyTorch layout (weights as (out, in[, k]))."""
    H = hidden_size
    nk = len(kernel_sizes)
    keys = iter(jax.random.split(key, 64))

    def nrm(shape, scale=0.1):
        return scale * jax.random.normal(next(keys), shape, jnp.float32)

    def bn(dim):
        gamma = 1.0 + nrm((dim,))
        beta = nrm((dim,))
        mean = nrm((dim,))
        var = 1.0 + 0.2 * jax.random.uniform(next(keys), (dim,), jnp.float32)
        return gamma, beta, mean, var

    raw = {
        "wr": nrm((H, input_size)), "br": nrm((H,)),
        "convs": [],
        "w1": nrm((H, nk * H)), "b1": nrm((H,)), "bn1": bn(H),
        "w2": nrm((H // 2, H)), "b2": nrm((H // 2,)), "bn2": bn(H // 2),
        "wo": nrm((1, H // 2)), "bo": nrm((1,)),
    }
    for k in kernel_sizes:
        raw["convs"].append((nrm((H, H, k)), nrm((H,))) + bn(H))
    return raw


def prep_params(raw, eps=1e-5, matmul_dtype=jnp.bfloat16):
    """Fold BN, fuse reshape-Linear into the conv matmul, pad lanes to 128.

    MXU weights are stored in bf16; biases and the output row stay in f32
    (bias-add / SiLU / output reduce run in f32 inside the kernel).
    """

    def fold(g, b, m, v):
        s = g / jnp.sqrt(v + eps)
        return s, b - m * s

    # conv center taps with BN folded into columns
    w_cols, b_cols = [], []
    for (cw, cb, g, b, m, v) in raw["convs"]:
        center = (cw.shape[-1] - 1) // 2
        wt = cw[:, :, center].T                      # (in=H, out=H)
        s, sh = fold(g, b, m, v)
        w_cols.append(wt * s[None, :])
        b_cols.append(cb * s + sh)
    wc = jnp.concatenate(w_cols, axis=1)             # (H, 3H)
    bc = jnp.concatenate(b_cols)                     # (3H,)

    # fuse reshape Linear (no nonlinearity in between)
    wf = raw["wr"].T @ wc                            # (F_in, 3H)
    bf = raw["br"] @ wc + bc                         # (3H,)

    # fc1 / fc2 with BN folded
    s1, sh1 = fold(*raw["bn1"])
    w1 = raw["w1"].T * s1[None, :]                   # (3H, H)
    b1 = raw["b1"] * s1 + sh1
    s2, sh2 = fold(*raw["bn2"])
    w2 = raw["w2"].T * s2[None, :]                   # (H, H//2)
    b2 = raw["b2"] * s2 + sh2

    # lane-pad feature dims to multiples of 128 (zero fill; exact since
    # silu(0)=0 and padded weight rows/cols are zero).  F_in is NOT padded.
    def pad2(w, rows, cols):
        return jnp.pad(w, ((0, rows - w.shape[0]), (0, cols - w.shape[1])))

    def pad1(b, cols):
        return jnp.pad(b, (0, cols - b.shape[0]))[None, :]

    C3, H, H2 = wf.shape[1], w1.shape[1], w2.shape[1]
    C3P, HP, H2P = (_round_up(d, 128) for d in (C3, H, H2))

    return {
        # bf16 MXU weights
        "wf": pad2(wf, wf.shape[0], C3P).astype(matmul_dtype),
        "w1": pad2(w1, C3P, HP).astype(matmul_dtype),
        "w2": pad2(w2, HP, H2P).astype(matmul_dtype),
        # f32 biases (bias-add + SiLU stay in f32)
        "bf": pad1(bf, C3P).astype(jnp.float32),
        "b1": pad1(b1, HP).astype(jnp.float32),
        "b2": pad1(b2, H2P).astype(jnp.float32),
        # output layer: single real row + scalar bias, f32 (VPU/XLU path)
        "wo": pad1(raw["wo"][0], H2P).astype(jnp.float32),   # (1, H2P)
        "bo": raw["bo"].reshape(1, 1).astype(jnp.float32),   # (1, 1)
    }


# --------------------------------------------------------------------------
# Plain-JAX reference (unfused, f32, from raw torch-layout params)
# --------------------------------------------------------------------------
def tdnn_reference(x, raw, eps=1e-5):
    def bn(y, g, b, m, v):
        return (y - m) * (g / jnp.sqrt(v + eps)) + b

    silu = jax.nn.silu
    h = x @ raw["wr"].T + raw["br"][None, :]
    outs = []
    for (cw, cb, g, b, m, v) in raw["convs"]:
        center = (cw.shape[-1] - 1) // 2
        y = h @ cw[:, :, center].T + cb[None, :]
        outs.append(silu(bn(y, g, b, m, v)))
    c = jnp.concatenate(outs, axis=1)
    f1 = silu(bn(c @ raw["w1"].T + raw["b1"][None, :], *raw["bn1"]))
    f2 = silu(bn(f1 @ raw["w2"].T + raw["b2"][None, :], *raw["bn2"]))
    return f2 @ raw["wo"].T + raw["bo"][None, :]


if __name__ == "__main__":
    B, INPUT_SIZE, HIDDEN = 8, 16, 32
    key = jax.random.PRNGKey(0)
    kx, kp = jax.random.split(key)
    x = jax.random.normal(kx, (B, INPUT_SIZE), jnp.float32)

    raw = init_raw_params(kp, INPUT_SIZE, HIDDEN)
    params = prep_params(raw)

    out = tdnn_forward(x, params)
    out = jax.block_until_ready(out)
    assert out.shape == (B, 1), out.shape

    ref = tdnn_reference(x, raw)
    # Tolerance loosened vs the f32 reference: bf16 matmul weights/activations
    # plus the EUP approximate reciprocal inside SiLU.
    assert jnp.allclose(out, ref, atol=2e-2, rtol=2e-2), (out, ref)

    print("KERNEL_OK")
</pallas_src>

<mosaic_0001>
module attributes {stable_mosaic.version = 11 : i64} {
  func.func @tdnn_kernel(%arg0: i32, %arg1: memref<128x16xbf16, #tpu.memory_space<vmem>>, %arg2: memref<16x128xbf16, #tpu.memory_space<vmem>>, %arg3: memref<1x128xf32, #tpu.memory_space<vmem>>, %arg4: memref<128x128xbf16, #tpu.memory_space<vmem>>, %arg5: memref<1x128xf32, #tpu.memory_space<vmem>>, %arg6: memref<128x128xbf16, #tpu.memory_space<vmem>>, %arg7: memref<1x128xf32, #tpu.memory_space<vmem>>, %arg8: memref<1x128xf32, #tpu.memory_space<vmem>>, %arg9: memref<1x1xf32, #tpu.memory_space<vmem>>, %arg10: memref<128x1xf32, #tpu.memory_space<vmem>>) attributes {dimension_semantics = [#tpu.dimension_semantics<parallel>], iteration_bounds = array<i64: 1>, scalar_prefetch = 0 : i64, scratch_operands = 0 : i64, tpu.core_type = #tpu.core_type<tc>, window_params = [{transform_indices = @transform_0, window_bounds = array<i64: 128, 16>}, {pipeline_mode = #tpu.pipeline_mode<synchronous>, transform_indices = @transform_1, window_bounds = array<i64: 16, 128>}, {pipeline_mode = #tpu.pipeline_mode<synchronous>, transform_indices = @transform_2, window_bounds = array<i64: 1, 128>}, {pipeline_mode = #tpu.pipeline_mode<synchronous>, transform_indices = @transform_3, window_bounds = array<i64: 128, 128>}, {pipeline_mode = #tpu.pipeline_mode<synchronous>, transform_indices = @transform_4, window_bounds = array<i64: 1, 128>}, {pipeline_mode = #tpu.pipeline_mode<synchronous>, transform_indices = @transform_5, window_bounds = array<i64: 128, 128>}, {pipeline_mode = #tpu.pipeline_mode<synchronous>, transform_indices = @transform_6, window_bounds = array<i64: 1, 128>}, {pipeline_mode = #tpu.pipeline_mode<synchronous>, transform_indices = @transform_7, window_bounds = array<i64: 1, 128>}, {pipeline_mode = #tpu.pipeline_mode<synchronous>, transform_indices = @transform_8, window_bounds = array<i64: 1, 1>}, {transform_indices = @transform_9, window_bounds = array<i64: 128, 1>}]} {
    %c0 = arith.constant 0 : index
    %c0_0 = arith.constant 0 : index
    %0 = vector.load %arg1[%c0, %c0_0] : memref<128x16xbf16, #tpu.memory_space<vmem>>, vector<128x16xbf16>
    %c0_1 = arith.constant 0 : index
    %c0_2 = arith.constant 0 : index
    %1 = vector.load %arg2[%c0_1, %c0_2] : memref<16x128xbf16, #tpu.memory_space<vmem>>, vector<16x128xbf16>
    %cst = arith.constant dense<0.000000e+00> : vector<128x128xf32>
    %2 = tpu.matmul %0, %1, %cst {dimension_numbers = #tpu.dot_dimension_numbers<[1], [0], [0], [1], [0, 0, 1, 1], [], []>} : vector<128x16xbf16>, vector<16x128xbf16>, vector<128x128xf32> -> vector<128x128xf32>
    %c0_3 = arith.constant 0 : index
    %c0_4 = arith.constant 0 : index
    %3 = vector.load %arg3[%c0_3, %c0_4] : memref<1x128xf32, #tpu.memory_space<vmem>>, vector<1x128xf32>
    %4 = vector.broadcast %3 : vector<1x128xf32> to vector<128x128xf32>
    %5 = arith.addf %2, %4 : vector<128x128xf32>
    %cst_5 = arith.constant 0.000000e+00 : f32
    %6 = vector.broadcast %cst_5 : f32 to vector<128x128xf32>
    %7 = arith.subf %6, %5 : vector<128x128xf32>
    %8 = math.exp %7 : vector<128x128xf32>
    %cst_6 = arith.constant 1.000000e+00 : f32
    %9 = vector.broadcast %cst_6 : f32 to vector<128x128xf32>
    %10 = arith.addf %9, %8 : vector<128x128xf32>
    %11 = tpu.reciprocal %10 {approx = true} : vector<128x128xf32> -> vector<128x128xf32>
    %12 = arith.mulf %5, %11 : vector<128x128xf32>
    %13 = arith.truncf %12 : vector<128x128xf32> to vector<128x128xbf16>
    %c0_7 = arith.constant 0 : index
    %c0_8 = arith.constant 0 : index
    %14 = vector.load %arg4[%c0_7, %c0_8] : memref<128x128xbf16, #tpu.memory_space<vmem>>, vector<128x128xbf16>
    %cst_9 = arith.constant dense<0.000000e+00> : vector<128x128xf32>
    %15 = tpu.matmul %13, %14, %cst_9 {dimension_numbers = #tpu.dot_dimension_numbers<[1], [0], [0], [1], [0, 0, 1, 1], [], []>} : vector<128x128xbf16>, vector<128x128xbf16>, vector<128x128xf32> -> vector<128x128xf32>
    %c0_10 = arith.constant 0 : index
    %c0_11 = arith.constant 0 : index
    %16 = vector.load %arg5[%c0_10, %c0_11] : memref<1x128xf32, #tpu.memory_space<vmem>>, vector<1x128xf32>
    %17 = vector.broadcast %16 : vector<1x128xf32> to vector<128x128xf32>
    %18 = arith.addf %15, %17 : vector<128x128xf32>
    %cst_12 = arith.constant 0.000000e+00 : f32
    %19 = vector.broadcast %cst_12 : f32 to vector<128x128xf32>
    %20 = arith.subf %19, %18 : vector<128x128xf32>
    %21 = math.exp %20 : vector<128x128xf32>
    %cst_13 = arith.constant 1.000000e+00 : f32
    %22 = vector.broadcast %cst_13 : f32 to vector<128x128xf32>
    %23 = arith.addf %22, %21 : vector<128x128xf32>
    %24 = tpu.reciprocal %23 {approx = true} : vector<128x128xf32> -> vector<128x128xf32>
    %25 = arith.mulf %18, %24 : vector<128x128xf32>
    %26 = arith.truncf %25 : vector<128x128xf32> to vector<128x128xbf16>
    %c0_14 = arith.constant 0 : index
    %c0_15 = arith.constant 0 : index
    %27 = vector.load %arg6[%c0_14, %c0_15] : memref<128x128xbf16, #tpu.memory_space<vmem>>, vector<128x128xbf16>
    %cst_16 = arith.constant dense<0.000000e+00> : vector<128x128xf32>
    %28 = tpu.matmul %26, %27, %cst_16 {dimension_numbers = #tpu.dot_dimension_numbers<[1], [0], [0], [1], [0, 0, 1, 1], [], []>} : vector<128x128xbf16>, vector<128x128xbf16>, vector<128x128xf32> -> vector<128x128xf32>
    %c0_17 = arith.constant 0 : index
    %c0_18 = arith.constant 0 : index
    %29 = vector.load %arg7[%c0_17, %c0_18] : memref<1x128xf32, #tpu.memory_space<vmem>>, vector<1x128xf32>
    %30 = vector.broadcast %29 : vector<1x128xf32> to vector<128x128xf32>
    %31 = arith.addf %28, %30 : vector<128x128xf32>
    %cst_19 = arith.constant 0.000000e+00 : f32
    %32 = vector.broadcast %cst_19 : f32 to vector<128x128xf32>
    %33 = arith.subf %32, %31 : vector<128x128xf32>
    %34 = math.exp %33 : vector<128x128xf32>
    %cst_20 = arith.constant 1.000000e+00 : f32
    %35 = vector.broadcast %cst_20 : f32 to vector<128x128xf32>
    %36 = arith.addf %35, %34 : vector<128x128xf32>
    %37 = tpu.reciprocal %36 {approx = true} : vector<128x128xf32> -> vector<128x128xf32>
    %38 = arith.mulf %31, %37 : vector<128x128xf32>
    %c0_21 = arith.constant 0 : index
    %c0_22 = arith.constant 0 : index
    %39 = vector.load %arg8[%c0_21, %c0_22] : memref<1x128xf32, #tpu.memory_space<vmem>>, vector<1x128xf32>
    %40 = vector.broadcast %39 : vector<1x128xf32> to vector<128x128xf32>
    %41 = arith.mulf %38, %40 : vector<128x128xf32>
    %cst_23 = arith.constant dense<0.000000e+00> : vector<128xf32>
    %42 = vector.multi_reduction <add>, %41, %cst_23 [1] : vector<128x128xf32> to vector<128xf32>
    %43 = vector.shape_cast %42 : vector<128xf32> to vector<128x1xf32>
    %c0_24 = arith.constant 0 : index
    %c0_25 = arith.constant 0 : index
    %44 = vector.load %arg9[%c0_24, %c0_25] : memref<1x1xf32, #tpu.memory_space<vmem>>, vector<1x1xf32>
    %45 = vector.broadcast %44 : vector<1x1xf32> to vector<128x1xf32>
    %46 = arith.addf %43, %45 : vector<128x1xf32>
    %c0_26 = arith.constant 0 : index
    %c0_27 = arith.constant 0 : index
    %47 = vector.load %arg10[%c0_26, %c0_27] : memref<128x1xf32, #tpu.memory_space<vmem>>, vector<128x1xf32>
    tpu.vector_store %arg10[%c0_26, %c0_27], %46 {strides = array<i32>} : memref<128x1xf32, #tpu.memory_space<vmem>>, vector<128x1xf32>,
    return
  }
  func.func @transform_0(%arg0: i32) -> (i32, i32) {
    %c0_i32 = arith.constant 0 : i32
    %c0_i32_0 = arith.constant 0 : i32
    return %arg0, %c0_i32 : i32, i32
  }
  func.func @transform_1(%arg0: i32) -> (i32, i32) {
    %c0_i32 = arith.constant 0 : i32
    %c0_i32_0 = arith.constant 0 : i32
    %c0_i32_1 = arith.constant 0 : i32
    return %c0_i32, %c0_i32_0 : i32, i32
  }
  func.func @transform_2(%arg0: i32) -> (i32, i32) {
    %c0_i32 = arith.constant 0 : i32
    %c0_i32_0 = arith.constant 0 : i32
    %c0_i32_1 = arith.constant 0 : i32
    return %c0_i32, %c0_i32_0 : i32, i32
  }
  func.func @transform_3(%arg0: i32) -> (i32, i32) {
    %c0_i32 = arith.constant 0 : i32
    %c0_i32_0 = arith.constant 0 : i32
    %c0_i32_1 = arith.constant 0 : i32
    return %c0_i32, %c0_i32_0 : i32, i32
  }
  func.func @transform_4(%arg0: i32) -> (i32, i32) {
    %c0_i32 = arith.constant 0 : i32
    %c0_i32_0 = arith.constant 0 : i32
    %c0_i32_1 = arith.constant 0 : i32
    return %c0_i32, %c0_i32_0 : i32, i32
  }
  func.func @transform_5(%arg0: i32) -> (i32, i32) {
    %c0_i32 = arith.constant 0 : i32
    %c0_i32_0 = arith.constant 0 : i32
    %c0_i32_1 = arith.constant 0 : i32
    return %c0_i32, %c0_i32_0 : i32, i32
  }
  func.func @transform_6(%arg0: i32) -> (i32, i32) {
    %c0_i32 = arith.constant 0 : i32
    %c0_i32_0 = arith.constant 0 : i32
    %c0_i32_1 = arith.constant 0 : i32
    return %c0_i32, %c0_i32_0 : i32, i32
  }
  func.func @transform_7(%arg0: i32) -> (i32, i32) {
    %c0_i32 = arith.constant 0 : i32
    %c0_i32_0 = arith.constant 0 : i32
    %c0_i32_1 = arith.constant 0 : i32
    return %c0_i32, %c0_i32_0 : i32, i32
  }
  func.func @transform_8(%arg0: i32) -> (i32, i32) {
    %c0_i32 = arith.constant 0 : i32
    %c0_i32_0 = arith.constant 0 : i32
    %c0_i32_1 = arith.constant 0 : i32
    return %c0_i32, %c0_i32_0 : i32, i32
  }
  func.func @transform_9(%arg0: i32) -> (i32, i32) {
    %c0_i32 = arith.constant 0 : i32
    %c0_i32_0 = arith.constant 0 : i32
    return %arg0, %c0_i32 : i32, i32
  }
}

</mosaic_0001>

<bundles_post_ra>
// kernel: tpu_custom_call.1
= control target key start
LH: loop header
LB: loop body
LE: loop exit
PB: predicated region body
PF: predicated region fallthrough
CT: control target
= control target key end

     0   :  { %s1466_s0 = inlined_call_operand.vmem [shape: bf16[128,16], index: 0, kind: input, shape index: {}]   ;;  %s1467_s1 = inlined_call_operand.vmem [shape: bf16[16,128], index: 1, kind: input, shape index: {}]   ;;  %s1468_s2 = inlined_call_operand.vmem [shape: f32[1,128], index: 2, kind: input, shape index: {}]   ;;  %s1469_s3 = inlined_call_operand.vmem [shape: bf16[128,128], index: 3, kind: input, shape index: {}]   ;;  %s1470_s4 = inlined_call_operand.vmem [shape: f32[1,128], index: 4, kind: input, shape index: {}]   ;;  %s1471_s5 = inlined_call_operand.hbm [shape: bf16[128,128], index: 5, kind: input, shape index: {}]   ;;  %s1472_s6 = inlined_call_operand.vmem [shape: f32[1,128], index: 6, kind: input, shape index: {}]   ;;  %s1473_s7 = inlined_call_operand.vmem [shape: f32[1,128], index: 7, kind: input, shape index: {}]   ;;  %s1474_s8 = inlined_call_operand.<no memory space> [shape: f32[1,1], index: 8, kind: input, shape index: {}]   ;;  %s1475_s9 = inlined_call_operand.vmem [shape: f32[128,1], index: 9, kind: output, shape index: {}]  }
   0x1   :  { %v14_v0 = vstv %s1474_s8 }
   0x2   :  { %15 = vst [vmem:[#allocation2] sm:$0x1] %v14_v0 }
   0x3   :  { %16 = vsyncpa [#allocation4], 0  ;;  %s31_s13 = sshll.u32 %s1471_s5, 4  ;;  %s1200_s14 = smov [#allocation3]   ;;  %s32_s13 = int_to_ptr.hbm [resolvable:$true] %s31_s13 }
   0x4   :  { %s33_s15 = sshll.u32 %s1200_s14, 4  ;;  %s1201_s16 = smov 64   ;;  %s34_s15 = int_to_ptr.vmem [resolvable:$true] %s33_s15 }
   0x5   :  { %s1202_s17 = smov 4  }
   0x6   :  { %39 = dma.hbm_to_vmem [thread:$0]  %s32_s13, 1024, %s34_s15, [#allocation4], %s1201_s16, %s1201_s16, %s1202_s17  }
   0x7   :  { %1198 = dma.done.wait [#allocation4], 1024  }
   0x8   :  { %1199 = vsyncadd [#allocation4], 4294966272  ;;  %v941_v1 = vld [vmem:[%s1467_s1] sm:$0xff]  ;;  %vm119_vm0 = vcmask 130048   ;;  %v934_v3 = vld [vmem:[%s1466_s0 + $0x8] sm:$0xff]  ;;  %vm803_vm1 = vcmask 7168  }
   0x9   :  { %v933_v2 = vld [vmem:[%s1466_s0] sm:$0xff]  ;;  %151 = vmatpush.bf16.msra.mxu0 %v941_v1  ;;  %v935_v4 = vld [vmem:[%s1466_s0 + $0x10] sm:$0xff]  ;;  %v936_v5 = vld [vmem:[%s1466_s0 + $0x18] sm:$0xff] }
   0xa   :  { %v937_v6 = vld [vmem:[%s1466_s0 + $0x20] sm:$0xff]  ;;  %v938_v7 = vld [vmem:[%s1466_s0 + $0x28] sm:$0xff]  ;;  %v939_v8 = vld [vmem:[%s1466_s0 + $0x30] sm:$0xff] }
   0xb   :  { %v949_v9 = vld [vmem:[%s1469_s3 + $0x38] sm:$0xff]  ;;  %v948_v10 = vld [vmem:[%s1469_s3 + $0x30] sm:$0xff]  ;;  %v947_v11 = vld [vmem:[%s1469_s3 + $0x28] sm:$0xff] }
   0xc   :  { %861 = vmatmul.msk.bf16.vlgmr.msra.gmra.mxu0 %vm119_vm0, %v933_v2  ;;  %365 = vmatpush.bf16.msra.mxu1 %v949_v9  ;;  %v946_v12 = vld [vmem:[%s1469_s3 + $0x20] sm:$0xff]  ;;  %v940_v13 = vld [vmem:[%s1466_s0 + $0x38] sm:$0xff]  ;;  %v944_v15 = vld [vmem:[%s1469_s3 + $0x10] sm:$0xff] }
   0xd   :  { %958 = vmatpush.bf16.msra.mxu3 %v949_v9  ;;  %v945_v14 = vld [vmem:[%s1469_s3 + $0x18] sm:$0xff]  ;;  %v943_v16 = vld [vmem:[%s1469_s3 + $0x8] sm:$0xff]  ;;  %v1318_v17 = vld [vmem:[%s1468_s2] ss:$0 sm:$0xff] }
   0xe   :  { %v942_v18 = vld [vmem:[%s1469_s3] sm:$0xff] }
  0x10   :  { %366 = vmatpush.bf16.msra.mxu1 %v948_v10 }
  0x11   :  { %959 = vmatpush.bf16.msra.mxu3 %v948_v10 }
  0x14   :  { %367 = vmatpush.bf16.msra.mxu1 %v947_v11 }
  0x15   :  { %960 = vmatpush.bf16.msra.mxu3 %v947_v11 }
  0x18   :  { %368 = vmatpush.bf16.msra.mxu1 %v946_v12 }
  0x19   :  { %961 = vmatpush.bf16.msra.mxu3 %v946_v12 }
  0x1c   :  { %862 = vmatmul.msk.bf16.gmra.mxu0 %vm119_vm0, %v934_v3  ;;  %369 = vmatpush.bf16.msra.mxu1 %v945_v14 }
  0x1d   :  { %962 = vmatpush.bf16.msra.mxu3 %v945_v14 }
  0x20   :  { %370 = vmatpush.bf16.msra.mxu1 %v944_v15 }
  0x21   :  { %963 = vmatpush.bf16.msra.mxu3 %v944_v15 }
  0x24   :  { %371 = vmatpush.bf16.msra.mxu1 %v943_v16 }
  0x25   :  { %964 = vmatpush.bf16.msra.mxu3 %v943_v16 }
  0x28   :  { %372 = vmatpush.bf16.msra.mxu1 %v942_v18 }
  0x29   :  { %965 = vmatpush.bf16.msra.mxu3 %v942_v18 }
  0x2c   :  { %863 = vmatmul.msk.bf16.gmra.mxu0 %vm119_vm0, %v935_v4 }
  0x3c   :  { %864 = vmatmul.msk.bf16.gmra.mxu0 %vm119_vm0, %v936_v5 }
  0x4c   :  { %865 = vmatmul.msk.bf16.gmra.mxu0 %vm119_vm0, %v937_v6 }
  0x5c   :  { %866 = vmatmul.msk.bf16.gmra.mxu0 %vm119_vm0, %v938_v7 }
  0x6c   :  { %867 = vmatmul.msk.bf16.gmra.mxu0 %vm119_vm0, %v939_v8 }
  0x7c   :  { %868 = vmatmul.msk.bf16.gmra.mxu0 %vm119_vm0, %v940_v13 }
  0x89   :  { %v153_v19 = vpop.f32.mrf.mxu0 }
  0x8a   :  { %v154_v20 = vadd.f32 %v1318_v17, %v153_v19 }
  0x8c   :  { %v193_v21 = vsub.f32 0.0, %v154_v20 }
  0x8e   :  { %v209_v22 = vmul.f32 1.442695, %v193_v21 }
  0x90   :  { %982 = vpow2.f32 %v209_v22 }
  0x91   :  { %v155_v23 = vpop.f32.mrf.mxu0 }
  0x92   :  { %v156_v24 = vadd.f32 %v1318_v17, %v155_v23 }
  0x94   :  { %v194_v25 = vsub.f32 0.0, %v156_v24 }
  0x96   :  { %v211_v26 = vmul.f32 1.442695, %v194_v25  ;;  %v983_v27 = vpop.eup %982 }
  0x97   :  { %v241_v30 = vadd.f32 1.0, %v983_v27 }
  0x98   :  { %984 = vpow2.f32 %v211_v26 }
  0x99   :  { %v158_v28 = vpop.f32.mrf.mxu0  ;;  %986 = vrcp.f32 %v241_v30 }
  0x9a   :  { %v159_v29 = vadd.f32 %v1318_v17, %v158_v28 }
  0x9c   :  { %v195_v31 = vsub.f32 0.0, %v159_v29 }
  0x9e   :  { %v985_v32 = vpop.eup %984  ;;  %v213_v33 = vmul.f32 1.442695, %v195_v31 }
  0x9f   :  { %v242_v34 = vadd.f32 1.0, %v985_v32  ;;  %v987_v38 = vpop.eup %986 }
  0xa0   :  { %v273_v42 = vmul.f32 %v987_v38, %v154_v20 }
  0xa1   :  { %988 = vrcp.f32 %v242_v34  ;;  %v160_v35 = vpop.f32.mrf.mxu0 }
  0xa2   :  { %990 = vpow2.f32 %v213_v33  ;;  %v161_v36 = vadd.f32 %v1318_v17, %v160_v35 }
  0xa4   :  { %v196_v37 = vsub.f32 0.0, %v161_v36 }
  0xa6   :  { %v215_v39 = vmul.f32 1.442695, %v196_v37 }
  0xa7   :  { %v989_v40 = vpop.eup %988 }
  0xa8   :  { %v991_v41 = vpop.eup %990  ;;  %v274_v43 = vmul.f32 %v989_v40, %v156_v24  ;;  %992 = vpow2.f32 %v215_v39 }
  0xa9   :  { %v163_v44 = vpop.f32.mrf.mxu0  ;;  %v243_v47 = vadd.f32 1.0, %v991_v41 }
  0xaa   :  { %v164_v45 = vadd.f32 %v1318_v17, %v163_v44  ;;  %v289_v46 = vpack.c.bf16 %v274_v43, %v273_v42 }
  0xab   :  { %994 = vrcp.f32 %v243_v47 }
  0xac   :  { %v197_v48 = vsub.f32 0.0, %v164_v45  ;;  %373 = vmatmul.bf16.vlgmr.msra.gmra.mxu1 %v289_v46 }
  0xae   :  { %v993_v49 = vpop.eup %992  ;;  %v217_v50 = vmul.f32 1.442695, %v197_v48 }
  0xaf   :  { %v244_v51 = vadd.f32 1.0, %v993_v49 }
  0xb1   :  { %996 = vrcp.f32 %v244_v51  ;;  %v165_v52 = vpop.f32.mrf.mxu0  ;;  %v995_v55 = vpop.eup %994 }
  0xb2   :  { %998 = vpow2.f32 %v217_v50  ;;  %v166_v53 = vadd.f32 %v1318_v17, %v165_v52  ;;  %v275_v59 = vmul.f32 %v995_v55, %v159_v29 }
  0xb4   :  { %v198_v54 = vsub.f32 0.0, %v166_v53 }
  0xb6   :  { %v219_v56 = vmul.f32 1.442695, %v198_v54 }
  0xb7   :  { %v997_v57 = vpop.eup %996 }
  0xb8   :  { %v999_v58 = vpop.eup %998  ;;  %v276_v60 = vmul.f32 %v997_v57, %v161_v36  ;;  %1000 = vpow2.f32 %v219_v56 }
  0xb9   :  { %v168_v61 = vpop.f32.mrf.mxu0  ;;  %v245_v0 = vadd.f32 1.0, %v999_v58 }
  0xba   :  { %v169_v62 = vadd.f32 %v1318_v17, %v168_v61  ;;  %v290_v63 = vpack.c.bf16 %v276_v60, %v275_v59 }
  0xbb   :  { %1002 = vrcp.f32 %v245_v0 }
  0xbc   :  { %v199_v1 = vsub.f32 0.0, %v169_v62  ;;  %378 = vmatmul.bf16.gmra.mxu1 %v290_v63 }
  0xbe   :  { %v1001_v2 = vpop.eup %1000  ;;  %v221_v3 = vmul.f32 1.442695, %v199_v1 }
  0xbf   :  { %v246_v4 = vadd.f32 1.0, %v1001_v2 }
  0xc1   :  { %1004 = vrcp.f32 %v246_v4  ;;  %v170_v5 = vpop.f32.mrf.mxu0  ;;  %v1003_v8 = vpop.eup %1002 }
  0xc2   :  { %1006 = vpow2.f32 %v221_v3  ;;  %v171_v6 = vadd.f32 %v1318_v17, %v170_v5  ;;  %v277_v12 = vmul.f32 %v1003_v8, %v164_v45 }
  0xc4   :  { %v200_v7 = vsub.f32 0.0, %v171_v6 }
  0xc6   :  { %v223_v9 = vmul.f32 1.442695, %v200_v7 }
  0xc7   :  { %v1005_v10 = vpop.eup %1004 }
  0xc8   :  { %v1007_v11 = vpop.eup %1006  ;;  %v278_v13 = vmul.f32 %v1005_v10, %v166_v53  ;;  %1008 = vpow2.f32 %v223_v9 }
  0xc9   :  { %v173_v14 = vpop.f32.mrf.mxu0  ;;  %v247_v18 = vadd.f32 1.0, %v1007_v11 }
  0xca   :  { %v174_v15 = vadd.f32 %v1318_v17, %v173_v14  ;;  %v291_v16 = vpack.c.bf16 %v278_v13, %v277_v12 }
  0xcb   :  { %1010 = vrcp.f32 %v247_v18 }
  0xcc   :  { %v201_v19 = vsub.f32 0.0, %v174_v15  ;;  %383 = vmatmul.bf16.gmra.mxu1 %v291_v16 }
  0xce   :  { %v1009_v20 = vpop.eup %1008  ;;  %v225_v21 = vmul.f32 1.442695, %v201_v19 }
  0xcf   :  { %v248_v22 = vadd.f32 1.0, %v1009_v20 }
  0xd1   :  { %1012 = vrcp.f32 %v248_v22  ;;  %v175_v23 = vpop.f32.mrf.mxu0  ;;  %v1011_v26 = vpop.eup %1010  ;;  %v957_v22 = vld [vmem:[#allocation3 + $0x38] sm:$0xff] }
  0xd2   :  { %1014 = vpow2.f32 %v225_v21  ;;  %v176_v24 = vadd.f32 %v1318_v17, %v175_v23  ;;  %v279_v30 = vmul.f32 %v1011_v26, %v169_v62  ;;  %586 = vmatpush.bf16.msra.mxu2 %v957_v22  ;;  %966 = vmatpush.bf16.msrb.mxu3 %v957_v22 }
  0xd4   :  { %v202_v25 = vsub.f32 0.0, %v176_v24 }
  0xd6   :  { %v227_v27 = vmul.f32 1.442695, %v202_v25  ;;  %v956_v25 = vld [vmem:[#allocation3 + $0x30] sm:$0xff] }
  0xd7   :  { %v1013_v28 = vpop.eup %1012  ;;  %587 = vmatpush.bf16.msra.mxu2 %v956_v25  ;;  %967 = vmatpush.bf16.msrb.mxu3 %v956_v25 }
  0xd8   :  { %v1015_v29 = vpop.eup %1014  ;;  %v280_v31 = vmul.f32 %v1013_v28, %v171_v6  ;;  %1016 = vpow2.f32 %v227_v27  ;;  %v954_v28 = vld [vmem:[#allocation3 + $0x20] sm:$0xff] }
  0xd9   :  { %v178_v32 = vpop.f32.mrf.mxu0  ;;  %v249_v35 = vadd.f32 1.0, %v1015_v29 }
  0xda   :  { %v179_v33 = vadd.f32 %v1318_v17, %v178_v32  ;;  %v292_v34 = vpack.c.bf16 %v280_v31, %v279_v30  ;;  %v953_v32 = vld [vmem:[#allocation3 + $0x18] sm:$0xff] }
  0xdb   :  { %1018 = vrcp.f32 %v249_v35  ;;  %v1342_v35 = vld [vmem:[%s1470_s4] ss:$0 sm:$0xff] }
  0xdc   :  { %v203_v36 = vsub.f32 0.0, %v179_v33  ;;  %388 = vmatmul.bf16.gmra.mxu1 %v292_v34  ;;  %v951_v34 = vld [vmem:[#allocation3 + $0x8] sm:$0xff] }
  0xde   :  { %v1017_v37 = vpop.eup %1016  ;;  %v229_v38 = vmul.f32 1.442695, %v203_v36  ;;  %v950_v36 = vld [vmem:[#allocation3] sm:$0xff] }
  0xdf   :  { %v250_v39 = vadd.f32 1.0, %v1017_v37 }
  0xe1   :  { %1020 = vrcp.f32 %v250_v39  ;;  %v180_v40 = vpop.f32.mrf.mxu0  ;;  %v1019_v43 = vpop.eup %1018 }
  0xe2   :  { %1022 = vpow2.f32 %v229_v38  ;;  %v181_v41 = vadd.f32 %v1318_v17, %v180_v40  ;;  %v281_v47 = vmul.f32 %v1019_v43, %v174_v15 }
  0xe4   :  { %v204_v42 = vsub.f32 0.0, %v181_v41 }
  0xe6   :  { %v231_v44 = vmul.f32 1.442695, %v204_v42 }
  0xe7   :  { %v1021_v45 = vpop.eup %1020 }
  0xe8   :  { %v1023_v46 = vpop.eup %1022  ;;  %v282_v48 = vmul.f32 %v1021_v45, %v176_v24  ;;  %1024 = vpow2.f32 %v231_v44 }
  0xe9   :  { %v183_v49 = vpop.f32.mrf.mxu0  ;;  %v251_v52 = vadd.f32 1.0, %v1023_v46 }
  0xea   :  { %v184_v50 = vadd.f32 %v1318_v17, %v183_v49  ;;  %v293_v51 = vpack.c.bf16 %v282_v48, %v281_v47 }
  0xeb   :  { %1026 = vrcp.f32 %v251_v52 }
  0xec   :  { %v205_v53 = vsub.f32 0.0, %v184_v50  ;;  %393 = vmatmul.bf16.gmra.mxu1 %v293_v51 }
  0xee   :  { %v1025_v54 = vpop.eup %1024  ;;  %v233_v55 = vmul.f32 1.442695, %v205_v53 }
  0xef   :  { %v252_v56 = vadd.f32 1.0, %v1025_v54 }
  0xf1   :  { %1028 = vrcp.f32 %v252_v56  ;;  %v185_v57 = vpop.f32.mrf.mxu0  ;;  %v1027_v60 = vpop.eup %1026 }
  0xf2   :  { %1030 = vpow2.f32 %v233_v55  ;;  %v186_v58 = vadd.f32 %v1318_v17, %v185_v57  ;;  %v283_v0 = vmul.f32 %v1027_v60, %v179_v33  ;;  %v952_v33 = vld [vmem:[#allocation3 + $0x10] sm:$0xff] }
  0xf4   :  { %v206_v59 = vsub.f32 0.0, %v186_v58 }
  0xf6   :  { %v235_v61 = vmul.f32 1.442695, %v206_v59 }
  0xf7   :  { %v1029_v62 = vpop.eup %1028 }
  0xf8   :  { %v1031_v63 = vpop.eup %1030  ;;  %v284_v1 = vmul.f32 %v1029_v62, %v181_v41  ;;  %1032 = vpow2.f32 %v235_v61 }
  0xf9   :  { %v188_v2 = vpop.f32.mrf.mxu0  ;;  %v253_v5 = vadd.f32 1.0, %v1031_v63 }
  0xfa   :  { %v189_v3 = vadd.f32 %v1318_v17, %v188_v2  ;;  %v294_v4 = vpack.c.bf16 %v284_v1, %v283_v0 }
  0xfb   :  { %1034 = vrcp.f32 %v253_v5 }
  0xfc   :  { %v207_v6 = vsub.f32 0.0, %v189_v3  ;;  %398 = vmatmul.bf16.gmra.mxu1 %v294_v4 }
  0xfe   :  { %v1033_v7 = vpop.eup %1032  ;;  %v237_v8 = vmul.f32 1.442695, %v207_v6 }
  0xff   :  { %v254_v9 = vadd.f32 1.0, %v1033_v7 }
 0x101   :  { %1036 = vrcp.f32 %v254_v9  ;;  %v190_v10 = vpop.f32.mrf.mxu0  ;;  %v1035_v13 = vpop.eup %1034 }
 0x102   :  { %1038 = vpow2.f32 %v237_v8  ;;  %v191_v11 = vadd.f32 %v1318_v17, %v190_v10  ;;  %v285_v18 = vmul.f32 %v1035_v13, %v184_v50  ;;  %v955_v17 = vld [vmem:[#allocation3 + $0x28] sm:$0xff] }
 0x103   :  { %588 = vmatpush.bf16.msra.mxu2 %v955_v17  ;;  %968 = vmatpush.bf16.msrb.mxu3 %v955_v17 }
 0x104   :  { %v208_v12 = vsub.f32 0.0, %v191_v11 }
 0x106   :  { %v239_v14 = vmul.f32 1.442695, %v208_v12 }
 0x107   :  { %v1037_v15 = vpop.eup %1036  ;;  %589 = vmatpush.bf16.msra.mxu2 %v954_v28  ;;  %969 = vmatpush.bf16.msrb.mxu3 %v954_v28 }
 0x108   :  { %v1039_v16 = vpop.eup %1038  ;;  %v286_v19 = vmul.f32 %v1037_v15, %v186_v58  ;;  %1040 = vpow2.f32 %v239_v14 }
 0x109   :  { %v255_v21 = vadd.f32 1.0, %v1039_v16 }
 0x10a   :  { %v295_v20 = vpack.c.bf16 %v286_v19, %v285_v18 }
 0x10b   :  { %1042 = vrcp.f32 %v255_v21  ;;  %590 = vmatpush.bf16.msra.mxu2 %v953_v32  ;;  %970 = vmatpush.bf16.msrb.mxu3 %v953_v32 }
 0x10c   :  { %403 = vmatmul.bf16.vlgmr.msra.gmra.mxu3 %v295_v20 }
 0x10e   :  { %v1041_v23 = vpop.eup %1040 }
 0x10f   :  { %v256_v24 = vadd.f32 1.0, %v1041_v23  ;;  %591 = vmatpush.bf16.msra.mxu2 %v952_v33  ;;  %971 = vmatpush.bf16.msrb.mxu3 %v952_v33 }
 0x111   :  { %1044 = vrcp.f32 %v256_v24  ;;  %v1043_v26 = vpop.eup %1042 }
 0x112   :  { %v287_v29 = vmul.f32 %v1043_v26, %v189_v3 }
 0x113   :  { %592 = vmatpush.bf16.msra.mxu2 %v951_v34  ;;  %972 = vmatpush.bf16.msrb.mxu3 %v951_v34 }
 0x117   :  { %v1045_v27 = vpop.eup %1044  ;;  %593 = vmatpush.bf16.msra.mxu2 %v950_v36  ;;  %973 = vmatpush.bf16.msrb.mxu3 %v950_v36 }
 0x118   :  { %v288_v30 = vmul.f32 %v1045_v27, %v191_v11 }
 0x11a   :  { %v296_v31 = vpack.c.bf16 %v288_v30, %v287_v29 }
 0x11c   :  { %408 = vmatmul.bf16.gmra.mxu3 %v296_v31 }
 0x129   :  { %v374_v37 = vpop.f32.mrf.mxu1 }
 0x12a   :  { %v375_v38 = vadd.f32 %v1342_v35, %v374_v37 }
 0x12c   :  { %v414_v39 = vsub.f32 0.0, %v375_v38 }
 0x12e   :  { %v430_v40 = vmul.f32 1.442695, %v414_v39 }
 0x130   :  { %1046 = vpow2.f32 %v430_v40 }
 0x131   :  { %v376_v41 = vpop.f32.mrf.mxu1 }
 0x132   :  { %v377_v42 = vadd.f32 %v1342_v35, %v376_v41 }
 0x134   :  { %v415_v43 = vsub.f32 0.0, %v377_v42 }
 0x136   :  { %v432_v44 = vmul.f32 1.442695, %v415_v43  ;;  %v1047_v45 = vpop.eup %1046 }
 0x137   :  { %v462_v48 = vadd.f32 1.0, %v1047_v45 }
 0x138   :  { %1048 = vpow2.f32 %v432_v44 }
 0x139   :  { %v379_v46 = vpop.f32.mrf.mxu1  ;;  %1050 = vrcp.f32 %v462_v48 }
 0x13a   :  { %v380_v47 = vadd.f32 %v1342_v35, %v379_v46 }
 0x13c   :  { %v416_v49 = vsub.f32 0.0, %v380_v47 }
 0x13e   :  { %v1049_v50 = vpop.eup %1048  ;;  %v434_v51 = vmul.f32 1.442695, %v416_v49 }
 0x13f   :  { %v463_v52 = vadd.f32 1.0, %v1049_v50  ;;  %v1051_v56 = vpop.eup %1050 }
 0x140   :  { %v494_v60 = vmul.f32 %v1051_v56, %v375_v38 }
 0x141   :  { %1052 = vrcp.f32 %v463_v52  ;;  %v381_v53 = vpop.f32.mrf.mxu1 }
 0x142   :  { %1054 = vpow2.f32 %v434_v51  ;;  %v382_v54 = vadd.f32 %v1342_v35, %v381_v53 }
 0x144   :  { %v417_v55 = vsub.f32 0.0, %v382_v54 }
 0x146   :  { %v436_v57 = vmul.f32 1.442695, %v417_v55 }
 0x147   :  { %v1053_v58 = vpop.eup %1052 }
 0x148   :  { %v1055_v59 = vpop.eup %1054  ;;  %v495_v61 = vmul.f32 %v1053_v58, %v377_v42  ;;  %1056 = vpow2.f32 %v436_v57 }
 0x149   :  { %v384_v62 = vpop.f32.mrf.mxu1  ;;  %v464_v1 = vadd.f32 1.0, %v1055_v59 }
 0x14a   :  { %v385_v63 = vadd.f32 %v1342_v35, %v384_v62  ;;  %v510_v0 = vpack.c.bf16 %v495_v61, %v494_v60 }
 0x14b   :  { %1058 = vrcp.f32 %v464_v1 }
 0x14c   :  { %v418_v2 = vsub.f32 0.0, %v385_v63  ;;  %594 = vmatmul.bf16.vlgmr.msra.gmra.mxu2 %v510_v0 }
 0x14e   :  { %v1057_v3 = vpop.eup %1056  ;;  %v438_v4 = vmul.f32 1.442695, %v418_v2 }
 0x14f   :  { %v465_v5 = vadd.f32 1.0, %v1057_v3 }
 0x151   :  { %1060 = vrcp.f32 %v465_v5  ;;  %v386_v6 = vpop.f32.mrf.mxu1  ;;  %v1059_v9 = vpop.eup %1058 }
 0x152   :  { %1062 = vpow2.f32 %v438_v4  ;;  %v387_v7 = vadd.f32 %v1342_v35, %v386_v6  ;;  %v496_v13 = vmul.f32 %v1059_v9, %v380_v47 }
 0x154   :  { %v419_v8 = vsub.f32 0.0, %v387_v7 }
 0x156   :  { %v440_v10 = vmul.f32 1.442695, %v419_v8 }
 0x157   :  { %v1061_v11 = vpop.eup %1060 }
 0x158   :  { %v1063_v12 = vpop.eup %1062  ;;  %v497_v14 = vmul.f32 %v1061_v11, %v382_v54  ;;  %1064 = vpow2.f32 %v440_v10 }
 0x159   :  { %v389_v15 = vpop.f32.mrf.mxu1  ;;  %v466_v19 = vadd.f32 1.0, %v1063_v12 }
 0x15a   :  { %v390_v16 = vadd.f32 %v1342_v35, %v389_v15  ;;  %v511_v18 = vpack.c.bf16 %v497_v14, %v496_v13 }
 0x15b   :  { %1066 = vrcp.f32 %v466_v19 }
 0x15c   :  { %v420_v20 = vsub.f32 0.0, %v390_v16  ;;  %599 = vmatmul.bf16.gmra.mxu2 %v511_v18 }
 0x15e   :  { %v1065_v21 = vpop.eup %1064  ;;  %v442_v22 = vmul.f32 1.442695, %v420_v20 }
 0x15f   :  { %v467_v23 = vadd.f32 1.0, %v1065_v21 }
 0x161   :  { %1068 = vrcp.f32 %v467_v23  ;;  %v391_v24 = vpop.f32.mrf.mxu1  ;;  %v1067_v26 = vpop.eup %1066 }
 0x162   :  { %1070 = vpow2.f32 %v442_v22  ;;  %v392_v25 = vadd.f32 %v1342_v35, %v391_v24  ;;  %v498_v30 = vmul.f32 %v1067_v26, %v385_v63 }
 0x164   :  { %v421_v17 = vsub.f32 0.0, %v392_v25 }
 0x166   :  { %v444_v27 = vmul.f32 1.442695, %v421_v17 }
 0x167   :  { %v1069_v28 = vpop.eup %1068 }
 0x168   :  { %v1071_v29 = vpop.eup %1070  ;;  %v499_v31 = vmul.f32 %v1069_v28, %v387_v7  ;;  %1072 = vpow2.f32 %v444_v27 }
 0x169   :  { %v394_v32 = vpop.f32.mrf.mxu1  ;;  %v468_v36 = vadd.f32 1.0, %v1071_v29 }
 0x16a   :  { %v395_v33 = vadd.f32 %v1342_v35, %v394_v32  ;;  %v512_v34 = vpack.c.bf16 %v499_v31, %v498_v30 }
 0x16b   :  { %1074 = vrcp.f32 %v468_v36 }
 0x16c   :  { %v422_v37 = vsub.f32 0.0, %v395_v33  ;;  %604 = vmatmul.bf16.gmra.mxu2 %v512_v34 }
 0x16e   :  { %v1073_v38 = vpop.eup %1072  ;;  %v446_v39 = vmul.f32 1.442695, %v422_v37 }
 0x16f   :  { %v469_v40 = vadd.f32 1.0, %v1073_v38 }
 0x171   :  { %1076 = vrcp.f32 %v469_v40  ;;  %v396_v41 = vpop.f32.mrf.mxu1  ;;  %v1075_v44 = vpop.eup %1074 }
 0x172   :  { %1078 = vpow2.f32 %v446_v39  ;;  %v397_v42 = vadd.f32 %v1342_v35, %v396_v41  ;;  %v500_v48 = vmul.f32 %v1075_v44, %v390_v16 }
 0x174   :  { %v423_v43 = vsub.f32 0.0, %v397_v42 }
 0x176   :  { %v448_v45 = vmul.f32 1.442695, %v423_v43 }
 0x177   :  { %v1077_v46 = vpop.eup %1076 }
 0x178   :  { %v1079_v47 = vpop.eup %1078  ;;  %v501_v49 = vmul.f32 %v1077_v46, %v392_v25  ;;  %1080 = vpow2.f32 %v448_v45  ;;  %v1363_v46 = vld [vmem:[%s1472_s6] ss:$0 sm:$0xff] }
 0x179   :  { %v399_v50 = vpop.f32.mrf.mxu1  ;;  %v470_v53 = vadd.f32 1.0, %v1079_v47 }
 0x17a   :  { %v400_v51 = vadd.f32 %v1342_v35, %v399_v50  ;;  %v513_v52 = vpack.c.bf16 %v501_v49, %v500_v48 }
 0x17b   :  { %1082 = vrcp.f32 %v470_v53 }
 0x17c   :  { %v424_v54 = vsub.f32 0.0, %v400_v51  ;;  %609 = vmatmul.bf16.gmra.mxu2 %v513_v52 }
 0x17e   :  { %v1081_v55 = vpop.eup %1080  ;;  %v450_v56 = vmul.f32 1.442695, %v424_v54 }
 0x17f   :  { %v471_v57 = vadd.f32 1.0, %v1081_v55 }
 0x181   :  { %1084 = vrcp.f32 %v471_v57  ;;  %v401_v58 = vpop.f32.mrf.mxu1  ;;  %v1083_v61 = vpop.eup %1082 }
 0x182   :  { %1086 = vpow2.f32 %v450_v56  ;;  %v402_v59 = vadd.f32 %v1342_v35, %v401_v58  ;;  %v502_v1 = vmul.f32 %v1083_v61, %v395_v33 }
 0x184   :  { %v425_v60 = vsub.f32 0.0, %v402_v59 }
 0x186   :  { %v452_v62 = vmul.f32 1.442695, %v425_v60 }
 0x187   :  { %v1085_v63 = vpop.eup %1084 }
 0x188   :  { %v1087_v0 = vpop.eup %1086  ;;  %v503_v2 = vmul.f32 %v1085_v63, %v397_v42  ;;  %1088 = vpow2.f32 %v452_v62  ;;  %v1371_v62 = vld [vmem:[%s1473_s7] ss:$0 sm:$0xff] }
 0x189   :  { %v472_v4 = vadd.f32 1.0, %v1087_v0 }
 0x18a   :  { %v514_v3 = vpack.c.bf16 %v503_v2, %v502_v1 }
 0x18b   :  { %1090 = vrcp.f32 %v472_v4 }
 0x18c   :  { %614 = vmatmul.bf16.gmra.mxu2 %v514_v3 }
 0x18e   :  { %v1089_v5 = vpop.eup %1088 }
 0x18f   :  { %v473_v6 = vadd.f32 1.0, %v1089_v5  ;;  %v404_v7 = vpop.f32.mrf.mxu3 }
 0x190   :  { %v405_v8 = vadd.f32 %v1342_v35, %v404_v7 }
 0x191   :  { %1092 = vrcp.f32 %v473_v6  ;;  %v1091_v11 = vpop.eup %1090 }
 0x192   :  { %v426_v9 = vsub.f32 0.0, %v405_v8  ;;  %v504_v14 = vmul.f32 %v1091_v11, %v400_v51 }
 0x194   :  { %v454_v10 = vmul.f32 1.442695, %v426_v9 }
 0x196   :  { %1094 = vpow2.f32 %v454_v10 }
 0x197   :  { %v1093_v12 = vpop.eup %1092  ;;  %v406_v13 = vpop.f32.mrf.mxu3 }
 0x198   :  { %v505_v15 = vmul.f32 %v1093_v12, %v402_v59  ;;  %v407_v16 = vadd.f32 %v1342_v35, %v406_v13 }
 0x19a   :  { %v427_v18 = vsub.f32 0.0, %v407_v16  ;;  %v515_v19 = vpack.c.bf16 %v505_v15, %v504_v14 }
 0x19c   :  { %v456_v20 = vmul.f32 1.442695, %v427_v18  ;;  %619 = vmatmul.bf16.gmra.mxu2 %v515_v19  ;;  %v1095_v21 = vpop.eup %1094 }
 0x19d   :  { %v474_v24 = vadd.f32 1.0, %v1095_v21 }
 0x19e   :  { %1096 = vpow2.f32 %v456_v20 }
 0x19f   :  { %v409_v22 = vpop.f32.mrf.mxu3  ;;  %1098 = vrcp.f32 %v474_v24 }
 0x1a0   :  { %v410_v23 = vadd.f32 %v1342_v35, %v409_v22 }
 0x1a2   :  { %v428_v25 = vsub.f32 0.0, %v410_v23 }
 0x1a4   :  { %v1097_v17 = vpop.eup %1096  ;;  %v458_v26 = vmul.f32 1.442695, %v428_v25 }
 0x1a5   :  { %v475_v27 = vadd.f32 1.0, %v1097_v17  ;;  %v1099_v31 = vpop.eup %1098 }
 0x1a6   :  { %v506_v36 = vmul.f32 %v1099_v31, %v405_v8 }
 0x1a7   :  { %1100 = vrcp.f32 %v475_v27  ;;  %v411_v28 = vpop.f32.mrf.mxu3 }
 0x1a8   :  { %1102 = vpow2.f32 %v458_v26  ;;  %v412_v29 = vadd.f32 %v1342_v35, %v411_v28 }
 0x1aa   :  { %v429_v30 = vsub.f32 0.0, %v412_v29 }
 0x1ac   :  { %v460_v32 = vmul.f32 1.442695, %v429_v30 }
 0x1ad   :  { %v1101_v33 = vpop.eup %1100 }
 0x1ae   :  { %v1103_v34 = vpop.eup %1102  ;;  %v507_v37 = vmul.f32 %v1101_v33, %v407_v16  ;;  %1104 = vpow2.f32 %v460_v32 }
 0x1af   :  { %v476_v39 = vadd.f32 1.0, %v1103_v34 }
 0x1b0   :  { %v516_v38 = vpack.c.bf16 %v507_v37, %v506_v36 }
 0x1b1   :  { %1106 = vrcp.f32 %v476_v39 }
 0x1b2   :  { %624 = vmatmul.bf16.vlgmr.msrb.gmra.mxu3 %v516_v38 }
 0x1b4   :  { %v1105_v40 = vpop.eup %1104 }
 0x1b5   :  { %v477_v41 = vadd.f32 1.0, %v1105_v40 }
 0x1b7   :  { %1108 = vrcp.f32 %v477_v41  ;;  %v1107_v42 = vpop.eup %1106 }
 0x1b8   :  { %v508_v44 = vmul.f32 %v1107_v42, %v410_v23 }
 0x1bd   :  { %v1109_v43 = vpop.eup %1108 }
 0x1be   :  { %v509_v45 = vmul.f32 %v1109_v43, %v412_v29 }
 0x1c0   :  { %v517_v35 = vpack.c.bf16 %v509_v45, %v508_v44 }
 0x1c2   :  { %629 = vmatmul.bf16.gmra.mxu3 %v517_v35 }
 0x1cf   :  { %v595_v47 = vpop.f32.mrf.mxu2 }
 0x1d0   :  { %v596_v48 = vadd.f32 %v1363_v46, %v595_v47 }
 0x1d2   :  { %v635_v49 = vsub.f32 0.0, %v596_v48 }
 0x1d4   :  { %v651_v50 = vmul.f32 1.442695, %v635_v49 }
 0x1d6   :  { %1110 = vpow2.f32 %v651_v50 }
 0x1d7   :  { %v597_v51 = vpop.f32.mrf.mxu2 }
 0x1d8   :  { %v598_v52 = vadd.f32 %v1363_v46, %v597_v51 }
 0x1da   :  { %v636_v53 = vsub.f32 0.0, %v598_v52 }
 0x1dc   :  { %v1111_v54 = vpop.eup %1110  ;;  %v653_v55 = vmul.f32 1.442695, %v636_v53 }
 0x1dd   :  { %v683_v56 = vadd.f32 1.0, %v1111_v54 }
 0x1de   :  { %1112 = vpow2.f32 %v653_v55 }
 0x1df   :  { %1114 = vrcp.f32 %v683_v56  ;;  %v600_v57 = vpop.f32.mrf.mxu2 }
 0x1e0   :  { %v601_v58 = vadd.f32 %v1363_v46, %v600_v57 }
 0x1e2   :  { %v637_v59 = vsub.f32 0.0, %v601_v58 }
 0x1e4   :  { %v1113_v60 = vpop.eup %1112  ;;  %v655_v61 = vmul.f32 1.442695, %v637_v59 }
 0x1e5   :  { %v1115_v63 = vpop.eup %1114  ;;  %v684_v0 = vadd.f32 1.0, %v1113_v60 }
 0x1e6   :  { %1116 = vpow2.f32 %v655_v61  ;;  %v715_v1 = vmul.f32 %v1115_v63, %v596_v48 }
 0x1e7   :  { %1118 = vrcp.f32 %v684_v0  ;;  %v602_v2 = vpop.f32.mrf.mxu2 }
 0x1e8   :  { %v603_v3 = vadd.f32 %v1363_v46, %v602_v2  ;;  %v735_v4 = vmul.f32 %v1371_v62, %v715_v1 }
 0x1ea   :  { %v638_v5 = vsub.f32 0.0, %v603_v3  ;;  %751 = vadd.xlane.f32.xlu0 %v735_v4 }
 0x1ec   :  { %v1117_v6 = vpop.eup %1116  ;;  %v657_v7 = vmul.f32 1.442695, %v638_v5 }
 0x1ed   :  { %v1119_v8 = vpop.eup %1118  ;;  %v685_v9 = vadd.f32 1.0, %v1117_v6 }
 0x1ee   :  { %v716_v10 = vmul.f32 %v1119_v8, %v598_v52  ;;  %1120 = vpow2.f32 %v657_v7 }
 0x1ef   :  { %1122 = vrcp.f32 %v685_v9  ;;  %v605_v11 = vpop.f32.mrf.mxu2 }
 0x1f0   :  { %v606_v12 = vadd.f32 %v1363_v46, %v605_v11  ;;  %v736_v13 = vmul.f32 %v1371_v62, %v716_v10 }
 0x1f2   :  { %v639_v14 = vsub.f32 0.0, %v606_v12  ;;  %753 = vadd.xlane.f32.xlu0 %v736_v13 }
 0x1f4   :  { %v1121_v15 = vpop.eup %1120  ;;  %v659_v16 = vmul.f32 1.442695, %v639_v14 }
 0x1f5   :  { %v1123_v18 = vpop.eup %1122  ;;  %v686_v19 = vadd.f32 1.0, %v1121_v15 }
 0x1f6   :  { %1124 = vpow2.f32 %v659_v16  ;;  %v717_v20 = vmul.f32 %v1123_v18, %v601_v58 }
 0x1f7   :  { %1126 = vrcp.f32 %v686_v19  ;;  %v607_v21 = vpop.f32.mrf.mxu2 }
 0x1f8   :  { %v608_v22 = vadd.f32 %v1363_v46, %v607_v21  ;;  %v737_v23 = vmul.f32 %v1371_v62, %v717_v20 }
 0x1fa   :  { %v640_v24 = vsub.f32 0.0, %v608_v22  ;;  %755 = vadd.xlane.f32.xlu1 %v737_v23 }
 0x1fc   :  { %v1125_v25 = vpop.eup %1124  ;;  %v661_v17 = vmul.f32 1.442695, %v640_v24 }
 0x1fd   :  { %v1127_v26 = vpop.eup %1126  ;;  %v687_v27 = vadd.f32 1.0, %v1125_v25 }
 0x1fe   :  { %v718_v28 = vmul.f32 %v1127_v26, %v603_v3  ;;  %1128 = vpow2.f32 %v661_v17 }
 0x1ff   :  { %1130 = vrcp.f32 %v687_v27  ;;  %v610_v29 = vpop.f32.mrf.mxu2 }
 0x200   :  { %v611_v30 = vadd.f32 %v1363_v46, %v610_v29  ;;  %v738_v31 = vmul.f32 %v1371_v62, %v718_v28 }
 0x202   :  { %v641_v32 = vsub.f32 0.0, %v611_v30  ;;  %757 = vadd.xlane.f32.xlu1 %v738_v31 }
 0x204   :  { %v1129_v33 = vpop.eup %1128  ;;  %v663_v34 = vmul.f32 1.442695, %v641_v32 }
 0x205   :  { %v1131_v36 = vpop.eup %1130  ;;  %v688_v37 = vadd.f32 1.0, %v1129_v33 }
 0x206   :  { %1132 = vpow2.f32 %v663_v34  ;;  %v719_v38 = vmul.f32 %v1131_v36, %v606_v12 }
 0x207   :  { %1134 = vrcp.f32 %v688_v37  ;;  %v612_v39 = vpop.f32.mrf.mxu2 }
 0x208   :  { %v613_v40 = vadd.f32 %v1363_v46, %v612_v39  ;;  %v739_v41 = vmul.f32 %v1371_v62, %v719_v38 }
 0x20a   :  { %v642_v42 = vsub.f32 0.0, %v613_v40  ;;  %759 = vadd.xlane.f32.xlu2 %v739_v41 }
 0x20c   :  { %v1133_v43 = vpop.eup %1132  ;;  %v665_v44 = vmul.f32 1.442695, %v642_v42 }
 0x20d   :  { %v1135_v45 = vpop.eup %1134  ;;  %v689_v35 = vadd.f32 1.0, %v1133_v43 }
 0x20e   :  { %v720_v47 = vmul.f32 %v1135_v45, %v608_v22  ;;  %1136 = vpow2.f32 %v665_v44 }
 0x20f   :  { %1138 = vrcp.f32 %v689_v35  ;;  %v615_v48 = vpop.f32.mrf.mxu2 }
 0x210   :  { %v616_v49 = vadd.f32 %v1363_v46, %v615_v48  ;;  %v740_v50 = vmul.f32 %v1371_v62, %v720_v47 }
 0x212   :  { %v643_v51 = vsub.f32 0.0, %v616_v49  ;;  %761 = vadd.xlane.f32.xlu2 %v740_v50 }
 0x214   :  { %v1137_v52 = vpop.eup %1136  ;;  %v667_v53 = vmul.f32 1.442695, %v643_v51 }
 0x215   :  { %v1139_v54 = vpop.eup %1138  ;;  %v690_v55 = vadd.f32 1.0, %v1137_v52 }
 0x216   :  { %v721_v56 = vmul.f32 %v1139_v54, %v611_v30  ;;  %1140 = vpow2.f32 %v667_v53 }
 0x217   :  { %1142 = vrcp.f32 %v690_v55  ;;  %v617_v57 = vpop.f32.mrf.mxu2 }
 0x218   :  { %v618_v58 = vadd.f32 %v1363_v46, %v617_v57  ;;  %v741_v59 = vmul.f32 %v1371_v62, %v721_v56 }
 0x21a   :  { %v644_v60 = vsub.f32 0.0, %v618_v58  ;;  %763 = vadd.xlane.f32.xlu0 %v741_v59 }
 0x21c   :  { %v1141_v61 = vpop.eup %1140  ;;  %v669_v63 = vmul.f32 1.442695, %v644_v60  ;;  %v981_v60 = vld [vmem:[#allocation2] ss:$0 sm:$0xff] }
 0x21d   :  { %v1143_v0 = vpop.eup %1142  ;;  %v691_v1 = vadd.f32 1.0, %v1141_v61 }
 0x21e   :  { %v722_v2 = vmul.f32 %v1143_v0, %v613_v40  ;;  %1144 = vpow2.f32 %v669_v63 }
 0x21f   :  { %1146 = vrcp.f32 %v691_v1  ;;  %v620_v3 = vpop.f32.mrf.mxu2 }
 0x220   :  { %v621_v4 = vadd.f32 %v1363_v46, %v620_v3  ;;  %v742_v5 = vmul.f32 %v1371_v62, %v722_v2 }
 0x222   :  { %v645_v6 = vsub.f32 0.0, %v621_v4  ;;  %765 = vadd.xlane.f32.xlu1 %v742_v5 }
 0x224   :  { %v1145_v7 = vpop.eup %1144  ;;  %v671_v8 = vmul.f32 1.442695, %v645_v6 }
 0x225   :  { %v1147_v9 = vpop.eup %1146  ;;  %v692_v10 = vadd.f32 1.0, %v1145_v7 }
 0x226   :  { %v723_v11 = vmul.f32 %v1147_v9, %v616_v49  ;;  %1148 = vpow2.f32 %v671_v8 }
 0x227   :  { %1150 = vrcp.f32 %v692_v10  ;;  %v622_v12 = vpop.f32.mrf.mxu2 }
 0x228   :  { %v623_v13 = vadd.f32 %v1363_v46, %v622_v12  ;;  %v743_v14 = vmul.f32 %v1371_v62, %v723_v11 }
 0x22a   :  { %v646_v15 = vsub.f32 0.0, %v623_v13  ;;  %767 = vadd.xlane.f32.xlu2 %v743_v14 }
 0x22c   :  { %v1149_v16 = vpop.eup %1148  ;;  %v673_v18 = vmul.f32 1.442695, %v646_v15 }
 0x22d   :  { %v1151_v19 = vpop.eup %1150  ;;  %v693_v20 = vadd.f32 1.0, %v1149_v16 }
 0x22e   :  { %v724_v21 = vmul.f32 %v1151_v19, %v618_v58  ;;  %1152 = vpow2.f32 %v673_v18 }
 0x22f   :  { %1154 = vrcp.f32 %v693_v20 }
 0x230   :  { %v744_v22 = vmul.f32 %v1371_v62, %v724_v21 }
 0x232   :  { %769 = vadd.xlane.f32.xlu0 %v744_v22 }
 0x234   :  { %v1153_v23 = vpop.eup %1152 }
 0x235   :  { %v1155_v24 = vpop.eup %1154  ;;  %v694_v25 = vadd.f32 1.0, %v1153_v23  ;;  %v625_v17 = vpop.f32.mrf.mxu3 }
 0x236   :  { %v725_v26 = vmul.f32 %v1155_v24, %v621_v4  ;;  %v626_v27 = vadd.f32 %v1363_v46, %v625_v17 }
 0x237   :  { %1156 = vrcp.f32 %v694_v25 }
 0x238   :  { %v647_v28 = vsub.f32 0.0, %v626_v27  ;;  %v745_v29 = vmul.f32 %v1371_v62, %v725_v26 }
 0x23a   :  { %v675_v30 = vmul.f32 1.442695, %v647_v28  ;;  %771 = vadd.xlane.f32.xlu1 %v745_v29 }
 0x23c   :  { %1158 = vpow2.f32 %v675_v30 }
 0x23d   :  { %v1157_v31 = vpop.eup %1156  ;;  %v627_v32 = vpop.f32.mrf.mxu3 }
 0x23e   :  { %v726_v33 = vmul.f32 %v1157_v31, %v623_v13  ;;  %v628_v34 = vadd.f32 %v1363_v46, %v627_v32 }
 0x240   :  { %v648_v36 = vsub.f32 0.0, %v628_v34  ;;  %v746_v37 = vmul.f32 %v1371_v62, %v726_v33 }
 0x242   :  { %v1159_v38 = vpop.eup %1158  ;;  %v677_v39 = vmul.f32 1.442695, %v648_v36  ;;  %773 = vadd.xlane.f32.xlu2 %v746_v37 }
 0x243   :  { %v695_v40 = vadd.f32 1.0, %v1159_v38 }
 0x244   :  { %1160 = vpow2.f32 %v677_v39 }
 0x245   :  { %1162 = vrcp.f32 %v695_v40  ;;  %v630_v41 = vpop.f32.mrf.mxu3 }
 0x246   :  { %v631_v42 = vadd.f32 %v1363_v46, %v630_v41 }
 0x248   :  { %v649_v43 = vsub.f32 0.0, %v631_v42 }
 0x24a   :  { %v1161_v44 = vpop.eup %1160  ;;  %v679_v45 = vmul.f32 1.442695, %v649_v43 }
 0x24b   :  { %v1163_v35 = vpop.eup %1162  ;;  %v696_v47 = vadd.f32 1.0, %v1161_v44 }
 0x24c   :  { %v727_v48 = vmul.f32 %v1163_v35, %v626_v27  ;;  %1164 = vpow2.f32 %v679_v45 }
 0x24d   :  { %1166 = vrcp.f32 %v696_v47  ;;  %v632_v49 = vpop.f32.mrf.mxu3 }
 0x24e   :  { %v633_v50 = vadd.f32 %v1363_v46, %v632_v49  ;;  %v747_v51 = vmul.f32 %v1371_v62, %v727_v48 }
 0x250   :  { %v650_v52 = vsub.f32 0.0, %v633_v50  ;;  %775 = vadd.xlane.f32.xlu0 %v747_v51 }
 0x252   :  { %v1165_v53 = vpop.eup %1164  ;;  %v681_v54 = vmul.f32 1.442695, %v650_v52 }
 0x253   :  { %v1167_v55 = vpop.eup %1166  ;;  %v697_v56 = vadd.f32 1.0, %v1165_v53 }
 0x254   :  { %v728_v57 = vmul.f32 %v1167_v55, %v628_v34  ;;  %1168 = vpow2.f32 %v681_v54 }
 0x255   :  { %1170 = vrcp.f32 %v697_v56 }
 0x256   :  { %v748_v58 = vmul.f32 %v1371_v62, %v728_v57 }
 0x258   :  { %777 = vadd.xlane.f32.xlu1 %v748_v58 }
 0x25a   :  { %v1169_v59 = vpop.eup %1168 }
 0x25b   :  { %v1171_v61 = vpop.eup %1170  ;;  %v698_v63 = vadd.f32 1.0, %v1169_v59 }
 0x25c   :  { %v729_v0 = vmul.f32 %v1171_v61, %v631_v42 }
 0x25d   :  { %1172 = vrcp.f32 %v698_v63  ;;  %v752_v46 = vpop.xlane.xlu0 %751 }
 0x25e   :  { %v787_v1 = vadd.f32 %v981_v60, %v752_v46  ;;  %v749_v2 = vmul.f32 %v1371_v62, %v729_v0 }
 0x260   :  { %804 = vst.msk [vmem:[%s1475_s9] sm:$0xff] %vm803_vm1, %v787_v1  ;;  %779 = vadd.xlane.f32.xlu2 %v749_v2 }
 0x263   :  { %v1173_v3 = vpop.eup %1172 }
 0x264   :  { %v730_v4 = vmul.f32 %v1173_v3, %v633_v50 }
 0x265   :  { %v754_v5 = vpop.xlane.xlu0 %753 }
 0x266   :  { %v788_v6 = vadd.f32 %v981_v60, %v754_v5  ;;  %v750_v7 = vmul.f32 %v1371_v62, %v730_v4 }
 0x268   :  { %805 = vst.msk [vmem:[%s1475_s9 + $0x8] sm:$0xff] %vm803_vm1, %v788_v6  ;;  %781 = vadd.xlane.f32.xlu0 %v750_v7 }
 0x26d   :  { %v756_v8 = vpop.xlane.xlu1 %755 }
 0x26e   :  { %v789_v9 = vadd.f32 %v981_v60, %v756_v8 }
 0x270   :  { %806 = vst.msk [vmem:[%s1475_s9 + $0x10] sm:$0xff] %vm803_vm1, %v789_v9 }
 0x275   :  { %v758_v10 = vpop.xlane.xlu1 %757 }
 0x276   :  { %v790_v11 = vadd.f32 %v981_v60, %v758_v10 }
 0x278   :  { %807 = vst.msk [vmem:[%s1475_s9 + $0x18] sm:$0xff] %vm803_vm1, %v790_v11 }
 0x27d   :  { %v760_v62 = vpop.xlane.xlu2 %759 }
 0x27e   :  { %v791_v12 = vadd.f32 %v981_v60, %v760_v62 }
 0x280   :  { %808 = vst.msk [vmem:[%s1475_s9 + $0x20] sm:$0xff] %vm803_vm1, %v791_v12 }
 0x285   :  { %v762_v13 = vpop.xlane.xlu2 %761 }
 0x286   :  { %v792_v14 = vadd.f32 %v981_v60, %v762_v13 }
 0x288   :  { %809 = vst.msk [vmem:[%s1475_s9 + $0x28] sm:$0xff] %vm803_vm1, %v792_v14 }
 0x28d   :  { %v764_v15 = vpop.xlane.xlu0 %763 }
 0x28e   :  { %v793_v16 = vadd.f32 %v981_v60, %v764_v15 }
 0x290   :  { %810 = vst.msk [vmem:[%s1475_s9 + $0x30] sm:$0xff] %vm803_vm1, %v793_v16 }
 0x295   :  { %v766_v18 = vpop.xlane.xlu1 %765 }
 0x296   :  { %v794_v19 = vadd.f32 %v981_v60, %v766_v18 }
 0x298   :  { %811 = vst.msk [vmem:[%s1475_s9 + $0x38] sm:$0xff] %vm803_vm1, %v794_v19 }
 0x29d   :  { %v768_v20 = vpop.xlane.xlu2 %767 }
 0x29e   :  { %v795_v21 = vadd.f32 %v981_v60, %v768_v20 }
 0x2a0   :  { %812 = vst.msk [vmem:[%s1475_s9 + $0x40] sm:$0xff] %vm803_vm1, %v795_v21 }
 0x2a5   :  { %v770_v22 = vpop.xlane.xlu0 %769 }
 0x2a6   :  { %v796_v23 = vadd.f32 %v981_v60, %v770_v22 }
 0x2a8   :  { %813 = vst.msk [vmem:[%s1475_s9 + $0x48] sm:$0xff] %vm803_vm1, %v796_v23 }
 0x2ad   :  { %v772_v24 = vpop.xlane.xlu1 %771 }
 0x2ae   :  { %v797_v25 = vadd.f32 %v981_v60, %v772_v24 }
 0x2b0   :  { %814 = vst.msk [vmem:[%s1475_s9 + $0x50] sm:$0xff] %vm803_vm1, %v797_v25 }
 0x2b5   :  { %v774_v17 = vpop.xlane.xlu2 %773 }
 0x2b6   :  { %v798_v26 = vadd.f32 %v981_v60, %v774_v17 }
 0x2b8   :  { %815 = vst.msk [vmem:[%s1475_s9 + $0x58] sm:$0xff] %vm803_vm1, %v798_v26 }
 0x2c3   :  { %v776_v27 = vpop.xlane.xlu0 %775 }
 0x2c4   :  { %v799_v28 = vadd.f32 %v981_v60, %v776_v27 }
 0x2c6   :  { %816 = vst.msk [vmem:[%s1475_s9 + $0x60] sm:$0xff] %vm803_vm1, %v799_v28 }
 0x2cb   :  { %v778_v29 = vpop.xlane.xlu1 %777 }
 0x2cc   :  { %v800_v30 = vadd.f32 %v981_v60, %v778_v29 }
 0x2ce   :  { %817 = vst.msk [vmem:[%s1475_s9 + $0x68] sm:$0xff] %vm803_vm1, %v800_v30 }
 0x2d3   :  { %v780_v31 = vpop.xlane.xlu2 %779 }
 0x2d4   :  { %v801_v32 = vadd.f32 %v981_v60, %v780_v31 }
 0x2d6   :  { %818 = vst.msk [vmem:[%s1475_s9 + $0x70] sm:$0xff] %vm803_vm1, %v801_v32 }
 0x2db   :  { %v782_v33 = vpop.xlane.xlu0 %781 }
 0x2dc   :  { %v802_v34 = vadd.f32 %v981_v60, %v782_v33 }
 0x2de   :  { %819 = vst.msk [vmem:[%s1475_s9 + $0x78] sm:$0xff] %vm803_vm1, %v802_v34 }
 0x2df   :  { %824 = vsyncpa [#allocation4], 1 }

</bundles_post_ra>
